<compile_context>
chip_gen: v6e
topology: v6e:2x2x1
jax: 0.10.0
libtpu: 0.0.40
codegen_flags: <defaults>
</compile_context>

<pallas_src>
import functools
import math

import jax
import jax.numpy as jnp
from jax.experimental import pallas as pl
from jax.experimental.pallas import tpu as pltpu


def _round_up(x, m):
    return (x + m - 1) // m * m


def _pad_lane(n, lane_align):
    """Pad a lane (last-dim) extent: always to 128; to `lane_align` once above 128."""
    p = _round_up(n, 128)
    if lane_align > 128 and p > 128:
        p = _round_up(p, lane_align)
    return p


def _maybe_pad(a, pads):
    """jnp.pad only when actually needed (skip HBM round-trip for aligned shapes)."""
    if all(lo == 0 and hi == 0 for lo, hi in pads):
        return a
    return jnp.pad(a, pads)


def _hw_config():
    """Per-generation (VMEM limit bytes, MXU lane alignment). Python/trace-time only."""
    vmem_phys = None
    try:
        vmem_phys = int(pltpu.get_tpu_info().vmem_capacity_bytes)
    except Exception:
        pass
    kind = ""
    try:
        kind = jax.devices()[0].device_kind.lower()
    except Exception:
        pass
    # v5e has a 4x128x128 MXU -> 128 alignment; v6e/v7x have 256x256 MXUs -> 256.
    lane_align = 128 if "v5" in kind else 256
    if vmem_phys is not None and vmem_phys > 96 * 1024 * 1024:
        # v5e / v6e: 128 MiB physical VMEM; leave headroom for Mosaic internals.
        vmem_limit = 100 * 1024 * 1024
    else:
        # v7x-class (64 MiB physical) or unknown: stay well under the physical cap.
        vmem_limit = 44 * 1024 * 1024
    return vmem_limit, lane_align


# ---------------------------------------------------------------------------
# Kernels
# ---------------------------------------------------------------------------

def ffn_kernel_resident(x_ref, w1_ref, b1_ref, w2_ref, b2_ref, o_ref):
    """Single-step body: full dff in one block (weights stay VMEM-resident)."""
    h = jnp.dot(x_ref[...], w1_ref[...], preferred_element_type=jnp.float32)
    h = jnp.maximum(h + b1_ref[...].astype(jnp.float32), 0.0)   # bias + ReLU in f32
    # Dropout(p) == identity (eval mode).
    out = jnp.dot(h.astype(w2_ref.dtype), w2_ref[...],
                  preferred_element_type=jnp.float32)
    o_ref[...] = (out + b2_ref[...].astype(jnp.float32)).astype(o_ref.dtype)


def ffn_kernel_tiled(x_ref, w1_ref, b1_ref, w2_ref, b2_ref, o_ref, acc_ref):
    """dff-tiled body: accumulate partial products over the last (arbitrary) axis."""
    f = pl.program_id(1)

    @pl.when(f == 0)
    def _init():
        acc_ref[...] = jnp.zeros_like(acc_ref)

    h = jnp.dot(x_ref[...], w1_ref[...], preferred_element_type=jnp.float32)
    h = jnp.maximum(h + b1_ref[...].astype(jnp.float32), 0.0)
    # Dropout(p) == identity (eval mode).
    acc_ref[...] += jnp.dot(h.astype(w2_ref.dtype), w2_ref[...],
                            preferred_element_type=jnp.float32)

    @pl.when(f == pl.num_programs(1) - 1)
    def _finalize():
        # b2 is added exactly once, in the finalize step.
        o_ref[...] = (acc_ref[...] + b2_ref[...].astype(jnp.float32)).astype(o_ref.dtype)


# ---------------------------------------------------------------------------
# Wrapper
# ---------------------------------------------------------------------------

@functools.partial(jax.jit, static_argnames=("tm_max", "tf_max", "mxu_dtype"))
def position_wise_ffn(x, w1, b1, w2, b2, *, tm_max=512, tf_max=512, mxu_dtype=None):
    """x: [..., d_model] -> [..., d_model]   (eval-mode FFN: Linear->ReLU->Linear)."""
    orig_shape = x.shape
    out_dtype = x.dtype
    d_model = orig_shape[-1]
    dff = w1.shape[1]

    x2d = x.reshape(-1, d_model)
    M = x2d.shape[0]

    # Optional MXU-friendly operand dtype (f32 accumulation is kept in the kernel).
    if mxu_dtype is not None:
        x2d = x2d.astype(mxu_dtype)
        w1 = w1.astype(mxu_dtype)
        w2 = w2.astype(mxu_dtype)

    vmem_limit, lane_align = _hw_config()
    x_bytes = jnp.dtype(x2d.dtype).itemsize
    w_bytes = jnp.dtype(w1.dtype).itemsize

    # Sublane alignment: 8 rows for 4-byte dtypes, 16 for 2-byte (bf16) packing.
    sub = 8 if x_bytes >= 4 else 16

    d_model_p = _pad_lane(d_model, lane_align)

    # ---- row tile (tm) ---------------------------------------------------
    tm_cap = max(sub, _round_up(min(tm_max, max(M, 1)), sub))
    if M <= tm_cap:
        # All rows fit in <= 2 blocks; use 2 blocks when possible so both v7x
        # TensorCores get work (a single cheap extra grid step elsewhere).
        tm = _round_up(-(-M // 2), sub) if M >= 2 * sub else _round_up(M, sub)
    else:
        # Largest sublane-aligned tile in [tm_cap/2, tm_cap] minimizing row padding.
        best_tm, best_pad = tm_cap, _round_up(M, tm_cap) - M
        cand = tm_cap - sub
        while cand >= max(sub, tm_cap // 2):
            pad = _round_up(M, cand) - M
            if pad < best_pad:
                best_tm, best_pad = cand, pad
            cand -= sub
        tm = best_tm

    # ---- dff tile (tf) & weight residency ---------------------------------
    def est_vmem(tm_, tf_, with_acc):
        return (
            2 * tm_ * d_model_p * x_bytes      # x blocks (double-buffered)
            + 2 * tm_ * d_model_p * x_bytes    # out blocks
            + 2 * d_model_p * tf_ * w_bytes    # W1 blocks
            + 2 * tf_ * d_model_p * w_bytes    # W2 blocks
            + 4 * (tf_ + d_model_p) * w_bytes  # biases (over-estimate)
            + tm_ * tf_ * 4                    # intermediate h tile (f32 VMEM temp)
            + (tm_ * d_model_p * 4 if with_acc else 0)  # f32 accumulator scratch
        )

    budget = int(0.85 * vmem_limit)
    dff_p_full = _pad_lane(dff, lane_align)

    resident = est_vmem(tm, dff_p_full, with_acc=False) <= budget
    if resident:
        tf = dff_p_full                      # single dff block -> weights DMA'd once
    else:
        tf = min(_round_up(tf_max, 128), dff_p_full)
        while tf > 256 and est_vmem(tm, tf, True) > budget:
            tf = max(256, _round_up(tf // 2, 128))
        while tm > max(2 * sub, 128) and est_vmem(tm, tf, True) > budget:
            tm = _round_up(tm // 2, sub)

    dff_p = dff_p_full if resident else _round_up(dff, tf)
    M_p = _round_up(M, tm)

    # ---- zero-pad operands (zero weight/bias padding is numerically inert) ----
    x_p = _maybe_pad(x2d, ((0, M_p - M), (0, d_model_p - d_model)))
    w1_p = _maybe_pad(w1, ((0, d_model_p - d_model), (0, dff_p - dff)))
    b1_p = _maybe_pad(b1.reshape(1, dff), ((0, 0), (0, dff_p - dff)))
    w2_p = _maybe_pad(w2, ((0, dff_p - dff), (0, d_model_p - d_model)))
    b2_p = _maybe_pad(b2.reshape(1, d_model), ((0, 0), (0, d_model_p - d_model)))

    if resident:
        kernel = ffn_kernel_resident
        dims = ("parallel",)
        grid_spec = pltpu.PrefetchScalarGridSpec(
            num_scalar_prefetch=0,
            grid=(M_p // tm,),
            in_specs=[
                pl.BlockSpec((tm, d_model_p), lambda i: (i, 0)),     # x row tile
                pl.BlockSpec((d_model_p, dff_p), lambda i: (0, 0)),  # W1 (resident)
                pl.BlockSpec((1, dff_p), lambda i: (0, 0)),          # b1 (resident)
                pl.BlockSpec((dff_p, d_model_p), lambda i: (0, 0)),  # W2 (resident)
                pl.BlockSpec((1, d_model_p), lambda i: (0, 0)),      # b2 (resident)
            ],
            out_specs=pl.BlockSpec((tm, d_model_p), lambda i: (i, 0)),
        )
    else:
        kernel = ffn_kernel_tiled
        dims = ("parallel", "arbitrary")
        grid_spec = pltpu.PrefetchScalarGridSpec(
            num_scalar_prefetch=0,
            grid=(M_p // tm, dff_p // tf),
            in_specs=[
                pl.BlockSpec((tm, d_model_p), lambda i, f: (i, 0)),   # x row tile
                pl.BlockSpec((d_model_p, tf), lambda i, f: (0, f)),   # W1 dff-tile
                pl.BlockSpec((1, tf), lambda i, f: (0, f)),           # b1 dff-tile
                pl.BlockSpec((tf, d_model_p), lambda i, f: (f, 0)),   # W2 dff-tile
                pl.BlockSpec((1, d_model_p), lambda i, f: (0, 0)),    # b2 (invariant)
            ],
            out_specs=pl.BlockSpec((tm, d_model_p), lambda i, f: (i, 0)),
            scratch_shapes=[pltpu.VMEM((tm, d_model_p), jnp.float32)],
        )

    out = pl.pallas_call(
        kernel,
        out_shape=jax.ShapeDtypeStruct((M_p, d_model_p), out_dtype),
        grid_spec=grid_spec,
        compiler_params=pltpu.CompilerParams(
            dimension_semantics=dims,
            vmem_limit_bytes=vmem_limit,
        ),
    )(x_p, w1_p, b1_p, w2_p, b2_p)

    return out[:M, :d_model].reshape(orig_shape)


def init_params(key, d_model, dff, dtype=jnp.float32):
    """Deterministic init mimicking nn.Linear default (uniform +/- 1/sqrt(fan_in))."""
    k1, k2, k3, k4 = jax.random.split(key, 4)
    lim1 = 1.0 / math.sqrt(d_model)
    lim2 = 1.0 / math.sqrt(dff)
    w1 = jax.random.uniform(k1, (d_model, dff), dtype, -lim1, lim1)
    b1 = jax.random.uniform(k2, (dff,), dtype, -lim1, lim1)
    w2 = jax.random.uniform(k3, (dff, d_model), dtype, -lim2, lim2)
    b2 = jax.random.uniform(k4, (d_model,), dtype, -lim2, lim2)
    return w1, b1, w2, b2


if __name__ == "__main__":
    key = jax.random.PRNGKey(0)
    kx, kp, kx2, kp2 = jax.random.split(key, 4)

    # Test 1: small, nicely shaped inputs.
    batch, seq, d_model, dff = 2, 8, 32, 64
    x = jax.random.normal(kx, (batch, seq, d_model), dtype=jnp.float32)
    w1, b1, w2, b2 = init_params(kp, d_model, dff)
    out = jax.block_until_ready(position_wise_ffn(x, w1, b1, w2, b2))
    ref = jnp.maximum(x @ w1 + b1, 0.0) @ w2 + b2
    assert out.shape == x.shape
    assert jnp.allclose(out, ref, atol=1e-4, rtol=1e-4), "mismatch vs reference (test 1)"

    # Test 2: awkward (unaligned) shapes to exercise padding + slicing.
    batch2, seq2, d_model2, dff2 = 3, 5, 48, 96
    x2 = jax.random.normal(kx2, (batch2, seq2, d_model2), dtype=jnp.float32)
    p2 = init_params(kp2, d_model2, dff2)
    out2 = jax.block_until_ready(position_wise_ffn(x2, *p2))
    ref2 = jnp.maximum(x2 @ p2[0] + p2[1], 0.0) @ p2[2] + p2[3]
    assert out2.shape == x2.shape
    assert jnp.allclose(out2, ref2, atol=1e-4, rtol=1e-4), "mismatch vs reference (test 2)"

    print("KERNEL_OK")
</pallas_src>

<mosaic_0001>
module attributes {stable_mosaic.version = 11 : i64} {
  func.func @ffn_kernel_resident(%arg0: i32, %arg1: memref<8x128xf32, #tpu.memory_space<vmem>>, %arg2: memref<128x128xf32, #tpu.memory_space<vmem>>, %arg3: memref<1x128xf32, #tpu.memory_space<vmem>>, %arg4: memref<128x128xf32, #tpu.memory_space<vmem>>, %arg5: memref<1x128xf32, #tpu.memory_space<vmem>>, %arg6: memref<8x128xf32, #tpu.memory_space<vmem>>) attributes {dimension_semantics = [#tpu.dimension_semantics<parallel>], iteration_bounds = array<i64: 2>, scalar_prefetch = 0 : i64, scratch_operands = 0 : i64, tpu.core_type = #tpu.core_type<tc>, window_params = [{transform_indices = @transform_0, window_bounds = array<i64: 8, 128>}, {pipeline_mode = #tpu.pipeline_mode<synchronous>, transform_indices = @transform_1, window_bounds = array<i64: 128, 128>}, {pipeline_mode = #tpu.pipeline_mode<synchronous>, transform_indices = @transform_2, window_bounds = array<i64: 1, 128>}, {pipeline_mode = #tpu.pipeline_mode<synchronous>, transform_indices = @transform_3, window_bounds = array<i64: 128, 128>}, {pipeline_mode = #tpu.pipeline_mode<synchronous>, transform_indices = @transform_4, window_bounds = array<i64: 1, 128>}, {transform_indices = @transform_5, window_bounds = array<i64: 8, 128>}]} {
    %c0 = arith.constant 0 : index
    %c0_0 = arith.constant 0 : index
    %0 = vector.load %arg1[%c0, %c0_0] : memref<8x128xf32, #tpu.memory_space<vmem>>, vector<8x128xf32>
    %c0_1 = arith.constant 0 : index
    %c0_2 = arith.constant 0 : index
    %1 = vector.load %arg2[%c0_1, %c0_2] : memref<128x128xf32, #tpu.memory_space<vmem>>, vector<128x128xf32>
    %cst = arith.constant dense<0.000000e+00> : vector<8x128xf32>
    %2 = tpu.matmul %0, %1, %cst {dimension_numbers = #tpu.dot_dimension_numbers<[1], [0], [0], [1], [0, 0, 1, 1], [], []>} : vector<8x128xf32>, vector<128x128xf32>, vector<8x128xf32> -> vector<8x128xf32>
    %c0_3 = arith.constant 0 : index
    %c0_4 = arith.constant 0 : index
    %3 = vector.load %arg3[%c0_3, %c0_4] : memref<1x128xf32, #tpu.memory_space<vmem>>, vector<1x128xf32>
    %4 = vector.broadcast %3 : vector<1x128xf32> to vector<8x128xf32>
    %5 = arith.addf %2, %4 : vector<8x128xf32>
    %cst_5 = arith.constant 0.000000e+00 : f32
    %6 = vector.broadcast %cst_5 : f32 to vector<8x128xf32>
    %7 = arith.maximumf %5, %6 : vector<8x128xf32>
    %c0_6 = arith.constant 0 : index
    %c0_7 = arith.constant 0 : index
    %8 = vector.load %arg4[%c0_6, %c0_7] : memref<128x128xf32, #tpu.memory_space<vmem>>, vector<128x128xf32>
    %cst_8 = arith.constant dense<0.000000e+00> : vector<8x128xf32>
    %9 = tpu.matmul %7, %8, %cst_8 {dimension_numbers = #tpu.dot_dimension_numbers<[1], [0], [0], [1], [0, 0, 1, 1], [], []>} : vector<8x128xf32>, vector<128x128xf32>, vector<8x128xf32> -> vector<8x128xf32>
    %c0_9 = arith.constant 0 : index
    %c0_10 = arith.constant 0 : index
    %10 = vector.load %arg5[%c0_9, %c0_10] : memref<1x128xf32, #tpu.memory_space<vmem>>, vector<1x128xf32>
    %11 = vector.broadcast %10 : vector<1x128xf32> to vector<8x128xf32>
    %12 = arith.addf %9, %11 : vector<8x128xf32>
    %c0_11 = arith.constant 0 : index
    %c0_12 = arith.constant 0 : index
    %13 = vector.load %arg6[%c0_11, %c0_12] : memref<8x128xf32, #tpu.memory_space<vmem>>, vector<8x128xf32>
    tpu.vector_store %arg6[%c0_11, %c0_12], %12 {strides = array<i32>} : memref<8x128xf32, #tpu.memory_space<vmem>>, vector<8x128xf32>,
    return
  }
  func.func @transform_0(%arg0: i32) -> (i32, i32) {
    %c0_i32 = arith.constant 0 : i32
    %c0_i32_0 = arith.constant 0 : i32
    return %arg0, %c0_i32 : i32, i32
  }
  func.func @transform_1(%arg0: i32) -> (i32, i32) {
    %c0_i32 = arith.constant 0 : i32
    %c0_i32_0 = arith.constant 0 : i32
    %c0_i32_1 = arith.constant 0 : i32
    return %c0_i32, %c0_i32_0 : i32, i32
  }
  func.func @transform_2(%arg0: i32) -> (i32, i32) {
    %c0_i32 = arith.constant 0 : i32
    %c0_i32_0 = arith.constant 0 : i32
    %c0_i32_1 = arith.constant 0 : i32
    return %c0_i32, %c0_i32_0 : i32, i32
  }
  func.func @transform_3(%arg0: i32) -> (i32, i32) {
    %c0_i32 = arith.constant 0 : i32
    %c0_i32_0 = arith.constant 0 : i32
    %c0_i32_1 = arith.constant 0 : i32
    return %c0_i32, %c0_i32_0 : i32, i32
  }
  func.func @transform_4(%arg0: i32) -> (i32, i32) {
    %c0_i32 = arith.constant 0 : i32
    %c0_i32_0 = arith.constant 0 : i32
    %c0_i32_1 = arith.constant 0 : i32
    return %c0_i32, %c0_i32_0 : i32, i32
  }
  func.func @transform_5(%arg0: i32) -> (i32, i32) {
    %c0_i32 = arith.constant 0 : i32
    %c0_i32_0 = arith.constant 0 : i32
    return %arg0, %c0_i32 : i32, i32
  }
}

</mosaic_0001>

<bundles_post_ra>
// kernel: position_wise_ffn.1
= control target key start
LH: loop header
LB: loop body
LE: loop exit
PB: predicated region body
PF: predicated region fallthrough
CT: control target
= control target key end

     0   :  { %s627_s18 = smov 0   ;;  %s791_s0 = inlined_call_operand.vmem [shape: f32[16,128], index: 0, kind: input, shape index: {}]   ;;  %s792_s1 = inlined_call_operand.vmem [shape: f32[128,128], index: 1, kind: input, shape index: {}]   ;;  %s793_s2 = inlined_call_operand.vmem [shape: f32[1,128], index: 2, kind: input, shape index: {}]   ;;  %s794_s3 = inlined_call_operand.vmem [shape: f32[128,128], index: 3, kind: input, shape index: {}]   ;;  %s795_s4 = inlined_call_operand.vmem [shape: f32[1,128], index: 4, kind: input, shape index: {}]   ;;  %s796_s5 = inlined_call_operand.vmem [shape: f32[16,128], index: 5, kind: output, shape index: {}]  }
   0x1 LB: > { %s462_s19 = sadd.s32 4294967295, %s593_s18   ;;  %p466_p0 = scmp.ge.s32.totalorder %s593_s18, 1  ;;  %s593_s18 = sphi %s627_s18, %s15_s18  }
   0x2   : > { %p186_p1 = scmp.lt.s32.totalorder %s593_s18, 3 }
   0x4   : > { %p187_p2 = pnand %p466_p0, %p186_p1 }
   0x5   : > { %p212_p3 = scmp.lt.s32.totalorder (!%p187_p2), %s462_s19, 1 }
   0x6   : > { %190 = sbr.rel (%p187_p2) target bundleno = 437 (0x1b5), region = 40 }
   0xb   : > { %v236_v0 = vld [vmem:[%s792_s1 + $0x78] sm:$0xff]  ;;  %v595_v1 = vmov 0.0   ;;  %v235_v2 = vld [vmem:[%s792_s1 + $0x70] sm:$0xff]  ;;  %vm596_vm0 = vmmov 0   ;;  %v234_v3 = vld [vmem:[%s792_s1 + $0x68] sm:$0xff]  ;;  %s798_s19 = smov (!%p212_p3, %s462_s19), 1 }
   0xc   : > { %507 = vmatprep.subr.mxu0 %v595_v1  ;;  %539 = vmatprep.mubr.msk.f32.mxu0 %vm596_vm0, %v595_v1  ;;  %v233_v4 = vld [vmem:[%s792_s1 + $0x60] sm:$0xff]  ;;  %v330_v5 = vld [vmem:[%s794_s3 + $0x78] sm:$0xff]  ;;  %v329_v6 = vld [vmem:[%s794_s3 + $0x70] sm:$0xff]  ;;  %s467_s22 = sshll.u32 %s798_s19, 3 }
   0xd   : > { %508 = vmatpush3.msra.mxu0 %v236_v0  ;;  %542 = vmatprep.subr.mxu1 %v595_v1  ;;  %v232_v7 = vld [vmem:[%s792_s1 + $0x58] sm:$0xff]  ;;  %v328_v8 = vld [vmem:[%s794_s3 + $0x68] sm:$0xff]  ;;  %v231_v9 = vld [vmem:[%s792_s1 + $0x50] sm:$0xff]  ;;  %s215_s6 = scalar_lea.vmem %s791_s0, %s467_s22  ;;  %s219_s26 = scalar_lea.vmem %s796_s5, %s467_s22 }
   0xe   : > { %509 = vmatprep.subr.mxu0 %v595_v1  ;;  %574 = vmatprep.mubr.msk.f32.mxu1 %vm596_vm0, %v595_v1  ;;  %v327_v10 = vld [vmem:[%s794_s3 + $0x60] sm:$0xff]  ;;  %v230_v11 = vld [vmem:[%s792_s1 + $0x48] sm:$0xff]  ;;  %v326_v12 = vld [vmem:[%s794_s3 + $0x58] sm:$0xff] }
   0xf   : > { %510 = vmatpush3.msra.mxu0 %v235_v2  ;;  %543 = vmatpush3.msra.mxu1 %v330_v5  ;;  %v229_v13 = vld [vmem:[%s792_s1 + $0x40] sm:$0xff]  ;;  %v325_v14 = vld [vmem:[%s794_s3 + $0x50] sm:$0xff]  ;;  %v228_v15 = vld [vmem:[%s792_s1 + $0x38] sm:$0xff] }
  0x10   : > { %511 = vmatprep.subr.mxu0 %v595_v1  ;;  %544 = vmatprep.subr.mxu1 %v595_v1  ;;  %v324_v16 = vld [vmem:[%s794_s3 + $0x48] sm:$0xff]  ;;  %v227_v17 = vld [vmem:[%s792_s1 + $0x30] sm:$0xff]  ;;  %v323_v18 = vld [vmem:[%s794_s3 + $0x40] sm:$0xff] }
  0x11   : > { %512 = vmatpush3.msra.mxu0 %v234_v3  ;;  %545 = vmatpush3.msra.mxu1 %v329_v6  ;;  %v226_v19 = vld [vmem:[%s792_s1 + $0x28] sm:$0xff]  ;;  %v322_v20 = vld [vmem:[%s794_s3 + $0x38] sm:$0xff]  ;;  %v225_v21 = vld [vmem:[%s792_s1 + $0x20] sm:$0xff] }
  0x12   : > { %513 = vmatprep.subr.mxu0 %v595_v1  ;;  %546 = vmatprep.subr.mxu1 %v595_v1  ;;  %v321_v22 = vld [vmem:[%s794_s3 + $0x30] sm:$0xff]  ;;  %v224_v23 = vld [vmem:[%s792_s1 + $0x18] sm:$0xff]  ;;  %v320_v24 = vld [vmem:[%s794_s3 + $0x28] sm:$0xff] }
  0x13   : > { %514 = vmatpush3.msra.mxu0 %v233_v4  ;;  %547 = vmatpush3.msra.mxu1 %v328_v8  ;;  %v223_v25 = vld [vmem:[%s792_s1 + $0x10] sm:$0xff]  ;;  %v319_v26 = vld [vmem:[%s794_s3 + $0x20] sm:$0xff]  ;;  %v222_v27 = vld [vmem:[%s792_s1 + $0x8] sm:$0xff] }
  0x14   : > { %515 = vmatprep.subr.mxu0 %v595_v1  ;;  %548 = vmatprep.subr.mxu1 %v595_v1  ;;  %v318_v28 = vld [vmem:[%s794_s3 + $0x18] sm:$0xff]  ;;  %v221_v29 = vld [vmem:[%s792_s1] sm:$0xff]  ;;  %v317_v31 = vld [vmem:[%s794_s3 + $0x10] sm:$0xff] }
  0x15   : > { %516 = vmatpush3.msra.mxu0 %v232_v7  ;;  %549 = vmatpush3.msra.mxu1 %v327_v10  ;;  %v220_v30 = vld [vmem:[%s215_s6] sm:$0xff]  ;;  %v316_v32 = vld [vmem:[%s794_s3 + $0x8] sm:$0xff] }
  0x16   : > { %517 = vmatprep.subr.mxu0 %v595_v1  ;;  %550 = vmatprep.subr.mxu1 %v595_v1  ;;  %v315_v33 = vld [vmem:[%s794_s3] sm:$0xff] }
  0x17   : > { %518 = vmatpush3.msra.mxu0 %v231_v9  ;;  %551 = vmatpush3.msra.mxu1 %v326_v12  ;;  %v469_v34 = vld [vmem:[%s793_s2] ss:$0 sm:$0xff] }
  0x18   : > { %519 = vmatprep.subr.mxu0 %v595_v1  ;;  %552 = vmatprep.subr.mxu1 %v595_v1  ;;  %v470_v39 = vld [vmem:[%s795_s4] ss:$0 sm:$0xff] }
  0x19   : > { %520 = vmatpush3.msra.mxu0 %v230_v11  ;;  %553 = vmatpush3.msra.mxu1 %v325_v14 }
  0x1a   : > { %521 = vmatprep.subr.mxu0 %v595_v1  ;;  %554 = vmatprep.subr.mxu1 %v595_v1 }
  0x1b   : > { %522 = vmatpush3.msra.mxu0 %v229_v13  ;;  %555 = vmatpush3.msra.mxu1 %v324_v16 }
  0x1c   : > { %523 = vmatprep.subr.mxu0 %v595_v1  ;;  %556 = vmatprep.subr.mxu1 %v595_v1 }
  0x1d   : > { %524 = vmatpush3.msra.mxu0 %v228_v15  ;;  %557 = vmatpush3.msra.mxu1 %v323_v18 }
  0x1e   : > { %525 = vmatprep.subr.mxu0 %v595_v1  ;;  %558 = vmatprep.subr.mxu1 %v595_v1 }
  0x1f   : > { %526 = vmatpush3.msra.mxu0 %v227_v17  ;;  %559 = vmatpush3.msra.mxu1 %v322_v20 }
  0x20   : > { %527 = vmatprep.subr.mxu0 %v595_v1  ;;  %560 = vmatprep.subr.mxu1 %v595_v1 }
  0x21   : > { %528 = vmatpush3.msra.mxu0 %v226_v19  ;;  %561 = vmatpush3.msra.mxu1 %v321_v22 }
  0x22   : > { %529 = vmatprep.subr.mxu0 %v595_v1  ;;  %562 = vmatprep.subr.mxu1 %v595_v1 }
  0x23   : > { %530 = vmatpush3.msra.mxu0 %v225_v21  ;;  %563 = vmatpush3.msra.mxu1 %v320_v24 }
  0x24   : > { %531 = vmatprep.subr.mxu0 %v595_v1  ;;  %564 = vmatprep.subr.mxu1 %v595_v1 }
  0x25   : > { %532 = vmatpush3.msra.mxu0 %v224_v23  ;;  %565 = vmatpush3.msra.mxu1 %v319_v26 }
  0x26   : > { %533 = vmatprep.subr.mxu0 %v595_v1  ;;  %566 = vmatprep.subr.mxu1 %v595_v1 }
  0x27   : > { %534 = vmatpush3.msra.mxu0 %v223_v25  ;;  %567 = vmatpush3.msra.mxu1 %v318_v28 }
  0x28   : > { %535 = vmatprep.subr.mxu0 %v595_v1  ;;  %568 = vmatprep.subr.mxu1 %v595_v1 }
  0x29   : > { %536 = vmatpush3.msra.mxu0 %v222_v27  ;;  %569 = vmatpush3.msra.mxu1 %v317_v31 }
  0x2a   : > { %537 = vmatprep.subr.mxu0 %v595_v1  ;;  %570 = vmatprep.subr.mxu1 %v595_v1 }
  0x2b   : > { %538 = vmatpush3.msra.mxu0 %v221_v29  ;;  %571 = vmatpush3.msra.mxu1 %v316_v32 }
  0x2c   : > { %540 = vmatmul.mubr.f32.vlgmr.msra.gmra.mxu0 %v220_v30  ;;  %572 = vmatprep.subr.mxu1 %v595_v1 }
  0x2d   : > { %573 = vmatpush3.msra.mxu1 %v315_v33 }
  0xec   : > { %v310_v35 = vpop.f32.mrf.mxu0 }
  0xed   : > { %v311_v36 = vadd.f32 %v469_v34, %v310_v35 }
  0xee   : > { %v541_v37 = vpop.f32.mrf.mxu0 }
  0xef   : > { %v314_v38 = vmax.f32 %v311_v36, 0.0 }
  0xf1   : > { %575 = vmatmul.mubr.f32.vlgmr.msra.gmra.mxu1 %v314_v38 }
 0x1b1   : > { %v404_v40 = vpop.f32.mrf.mxu1 }
 0x1b2   : > { %v405_v41 = vadd.f32 %v470_v39, %v404_v40 }
 0x1b3   : > { %v576_v42 = vpop.f32.mrf.mxu1 }
 0x1b4   : > { %408 = vst [vmem:[%s219_s26] sm:$0xff] %v405_v41 }
 0x1b5 PF: > { %s15_s18 = sadd.s32 1, %s593_s18  }
 0x1b6   : > { %p12_p4 = scmp.ge.s32.totalorder %s15_s18, 4  }
 0x1b8   :  { %14 = sbr.rel (!%p12_p4) target bundleno = 1 (0x1), region = 70 }

</bundles_post_ra>
